<compile_context>
chip_gen: v7x
topology: tpu7x:2x2x1
jax: 0.10.0
libtpu: 0.0.40
codegen_flags: <defaults>
</compile_context>

<pallas_src>
import jax
import jax.numpy as jnp
from jax.experimental import pallas as pl
from jax.experimental.pallas import tpu as pltpu

HIDDEN_SIZE = 1024
_MAX_BATCH_TILE = 2048     # 8 MiB f32 rows of H=1024; 16 MiB double-buffered


def _pooler_head_kernel(b_ref,            # SMEM: (1,) bias
                        x_ref, w_ref,     # VMEM: (bt, H) pooler tile, (1, H) weight row
                        out_ref):         # VMEM: (bt, 1)
    x = x_ref[...].astype(jnp.float32)                     # (bt, H)
    w = w_ref[...].astype(jnp.float32)                     # (1, H) broadcasts over bt
    # Linear(H, 1): VPU elementwise multiply + XLU cross-lane reduce.
    logits = jnp.sum(x * w, axis=-1, keepdims=True)        # (bt, 1)
    out_ref[...] = logits + b_ref[0]


def _round_up(x, m):
    return ((x + m - 1) // m) * m


def _pick_batch_tile(b_pad):
    """Largest sublane-aligned tile, capped at _MAX_BATCH_TILE.

    For b_pad >= 16 the tile is at most ~half the batch so the grid has >= 2
    steps (lets v7x's two TensorCores split the "parallel" batch axis).
    """
    if b_pad <= 8:
        return b_pad
    half = _round_up(pl.cdiv(b_pad, 2), 8)
    return min(_MAX_BATCH_TILE, half)


@jax.jit
def pooler_model_head(pooler_output, lin_w, lin_b):
    """Post-backbone part of PoolerModel.forward.

    pooler_output: (B, H) f32/bf16  -- outputs[1] of the HF backbone
    lin_w: (1, H) f32  (torch nn.Linear weight layout)
    lin_b: (1,)  f32
    returns preds: (B,) f32
    """
    B, H = pooler_output.shape
    assert H == HIDDEN_SIZE

    # Pad the batch to a sublane multiple; padded rows are sliced off below.
    b_pad = _round_up(B, 8)
    x = pooler_output
    if b_pad != B:
        x = jnp.pad(x, ((0, b_pad - B), (0, 0)))

    bt = _pick_batch_tile(b_pad)
    grid = (pl.cdiv(b_pad, bt),)          # Pallas handles a partial last block

    out = pl.pallas_call(
        _pooler_head_kernel,
        out_shape=jax.ShapeDtypeStruct((b_pad, 1), jnp.float32),
        grid_spec=pl.GridSpec(
            grid=grid,
            in_specs=[
                pl.BlockSpec(memory_space=pltpu.MemorySpace.SMEM),   # bias
                pl.BlockSpec((bt, H), lambda i: (i, 0)),             # pooler tile
                pl.BlockSpec((1, H), lambda i: (0, 0)),              # weight row
            ],
            out_specs=pl.BlockSpec((bt, 1), lambda i: (i, 0)),
        ),
        compiler_params=pltpu.CompilerParams(
            dimension_semantics=("parallel",),
            # 2 x 8 MiB double-buffered x tiles + tiny weight/output buffers;
            # raise past v5e's 16 MiB scoped default, well under v7x's 64 MiB.
            vmem_limit_bytes=32 << 20,
        ),
    )(lin_b, x, lin_w)
    return out[:B, 0]


def _reference(pooler_output, lin_w, lin_b):
    logits = pooler_output @ lin_w.T + lin_b               # (B, 1)
    return logits[:, 0]


if __name__ == "__main__":
    # TODO(synk): the HuggingFace AutoModel backbone (which produces
    # pooler_output = outputs[1]) and the MSELoss training branch have no clean
    # Pallas equivalent; pooler_output is synthesized directly here.
    key = jax.random.PRNGKey(0)
    k_x, k_w, k_b = jax.random.split(key, 3)

    B = 4
    pooler_output = jax.random.normal(k_x, (B, HIDDEN_SIZE), dtype=jnp.float32)
    lin_w = jax.random.normal(k_w, (1, HIDDEN_SIZE), jnp.float32) * 0.02
    lin_b = jax.random.normal(k_b, (1,), jnp.float32) * 0.02

    preds = pooler_model_head(pooler_output, lin_w, lin_b)
    preds = jax.block_until_ready(preds)

    ref = _reference(pooler_output, lin_w, lin_b)
    assert preds.shape == (B,)
    assert jnp.allclose(preds, ref, atol=1e-5, rtol=1e-5), (preds, ref)
    print("KERNEL_OK")
</pallas_src>

<mosaic_0001>
module attributes {stable_mosaic.version = 11 : i64} {
  func.func @_pooler_head_kernel(%arg0: i32, %arg1: memref<1xf32, #tpu.memory_space<smem>>, %arg2: memref<8x1024xf32, #tpu.memory_space<vmem>>, %arg3: memref<1x1024xf32, #tpu.memory_space<vmem>>, %arg4: memref<8x1xf32, #tpu.memory_space<vmem>>) attributes {dimension_semantics = [#tpu.dimension_semantics<parallel>], iteration_bounds = array<i64: 1>, scalar_prefetch = 0 : i64, scratch_operands = 0 : i64, tpu.core_type = #tpu.core_type<tc>, window_params = [{transform_indices = @transform_0, window_bounds = array<i64: 1>}, {transform_indices = @transform_1, window_bounds = array<i64: 8, 1024>}, {pipeline_mode = #tpu.pipeline_mode<synchronous>, transform_indices = @transform_2, window_bounds = array<i64: 1, 1024>}, {transform_indices = @transform_3, window_bounds = array<i64: 8, 1>}]} {
    %c0 = arith.constant 0 : index
    %c0_0 = arith.constant 0 : index
    %0 = vector.load %arg2[%c0, %c0_0] : memref<8x1024xf32, #tpu.memory_space<vmem>>, vector<8x1024xf32>
    %c0_1 = arith.constant 0 : index
    %c0_2 = arith.constant 0 : index
    %1 = vector.load %arg3[%c0_1, %c0_2] : memref<1x1024xf32, #tpu.memory_space<vmem>>, vector<1x1024xf32>
    %2 = vector.broadcast %1 : vector<1x1024xf32> to vector<8x1024xf32>
    %3 = arith.mulf %0, %2 : vector<8x1024xf32>
    %cst = arith.constant dense<0.000000e+00> : vector<8xf32>
    %4 = vector.multi_reduction <add>, %3, %cst [1] : vector<8x1024xf32> to vector<8xf32>
    %5 = vector.shape_cast %4 : vector<8xf32> to vector<8x1xf32>
    %c0_3 = arith.constant 0 : index
    %6 = memref.load %arg1[%c0_3] : memref<1xf32, #tpu.memory_space<smem>>
    %7 = vector.broadcast %6 : f32 to vector<8x1xf32>
    %8 = arith.addf %5, %7 : vector<8x1xf32>
    %c0_4 = arith.constant 0 : index
    %c0_5 = arith.constant 0 : index
    %9 = vector.load %arg4[%c0_4, %c0_5] : memref<8x1xf32, #tpu.memory_space<vmem>>, vector<8x1xf32>
    tpu.vector_store %arg4[%c0_4, %c0_5], %8 {strides = array<i32>} : memref<8x1xf32, #tpu.memory_space<vmem>>, vector<8x1xf32>,
    return
  }
  func.func @transform_0(%arg0: i32) -> i32 {
    %c0_i32 = arith.constant 0 : i32
    %c0_i32_0 = arith.constant 0 : i32
    return %c0_i32 : i32
  }
  func.func @transform_1(%arg0: i32) -> (i32, i32) {
    %c0_i32 = arith.constant 0 : i32
    %c0_i32_0 = arith.constant 0 : i32
    return %arg0, %c0_i32 : i32, i32
  }
  func.func @transform_2(%arg0: i32) -> (i32, i32) {
    %c0_i32 = arith.constant 0 : i32
    %c0_i32_0 = arith.constant 0 : i32
    %c0_i32_1 = arith.constant 0 : i32
    return %c0_i32, %c0_i32_0 : i32, i32
  }
  func.func @transform_3(%arg0: i32) -> (i32, i32) {
    %c0_i32 = arith.constant 0 : i32
    %c0_i32_0 = arith.constant 0 : i32
    return %arg0, %c0_i32 : i32, i32
  }
}

</mosaic_0001>

<bundles_post_ra>
// kernel: pooler_model_head.1
= control target key start
LH: loop header
LB: loop body
LE: loop exit
PB: predicated region body
PF: predicated region fallthrough
CT: control target
= control target key end

     0   :  { %v25_v0 = vlaneseq  ;;  %vm85_vm0 = vcmask 7168   ;;  %s144_s2 = inlined_call_operand.vmem [shape: f32[1,1024], index: 2, kind: input, shape index: {}]   ;;  %s145_s1 = inlined_call_operand.vmem [shape: f32[8,1024], index: 1, kind: input, shape index: {}]   ;;  %s146_s0 = inlined_call_operand.<no memory space> [shape: f32[1], index: 0, kind: input, shape index: {}]   ;;  %s147_s3 = inlined_call_operand.vmem [shape: f32[8,1], index: 3, kind: output, shape index: {}]  }
   0x1   :  { %v23_v2 = vld [vmem:[%s144_s2] sm:$0xff]  ;;  %v16_v8 = vld [vmem:[%s145_s1 + $0x8] sm:$0xff]  ;;  %v17_v9 = vld [vmem:[%s145_s1 + $0x10] sm:$0xff]  ;;  %v83_v42 = vstv %s146_s0 }
   0x2   :  { %v26_v1 = vshrl.u32 %v25_v0, 7  ;;  %v15_v7 = vld [vmem:[%s145_s1] sm:$0xff]  ;;  %v18_v16 = vld [vmem:[%s145_s1 + $0x18] sm:$0xff]  ;;  %v20_v27 = vld [vmem:[%s145_s1 + $0x28] sm:$0xff] }
   0x3   :  { %v19_v22 = vld [vmem:[%s145_s1 + $0x20] sm:$0xff]  ;;  %v21_v31 = vld [vmem:[%s145_s1 + $0x30] sm:$0xff]  ;;  %v22_v35 = vld [vmem:[%s145_s1 + $0x38] sm:$0xff] }
   0x4   :  { %v27_v3 = vsub.s32 0, %v26_v1  ;;  %v31_v4 = vsub.s32 1, %v26_v1  ;;  %v35_v5 = vsub.s32 2, %v26_v1  ;;  %v39_v6 = vsub.s32 3, %v26_v1 }
   0x5   :  { %v43_v10 = vsub.s32 4, %v26_v1  ;;  %v47_v11 = vsub.s32 5, %v26_v1  ;;  %v51_v17 = vsub.s32 6, %v26_v1  ;;  %v55_v24 = vsub.s32 7, %v26_v1 }
   0x6   :  { %v28_v12 = vrot.slane %v23_v2, %v27_v3  ;;  %v32_v13 = vrot.slane %v23_v2, %v31_v4  ;;  %v36_v14 = vrot.slane %v23_v2, %v35_v5  ;;  %v40_v15 = vrot.slane %v23_v2, %v39_v6 }
   0x7   :  { %v44_v18 = vrot.slane %v23_v2, %v43_v10  ;;  %v48_v23 = vrot.slane %v23_v2, %v47_v11  ;;  %v52_v28 = vrot.slane %v23_v2, %v51_v17  ;;  %v56_v32 = vrot.slane %v23_v2, %v55_v24 }
   0x8   :  { %v65_v19 = vmul.f32 %v28_v12, %v15_v7  ;;  %v66_v20 = vmul.f32 %v32_v13, %v16_v8  ;;  %v67_v21 = vmul.f32 %v36_v14, %v17_v9  ;;  %v68_v25 = vmul.f32 %v40_v15, %v18_v16 }
   0x9   :  { %v69_v29 = vmul.f32 %v44_v18, %v19_v22  ;;  %v70_v33 = vmul.f32 %v48_v23, %v20_v27  ;;  %v71_v36 = vmul.f32 %v52_v28, %v21_v31  ;;  %v72_v38 = vmul.f32 %v56_v32, %v22_v35 }
   0xa   :  { %v73_v26 = vadd.f32 %v66_v20, %v65_v19 }
   0xc   :  { %v74_v30 = vadd.f32 %v73_v26, %v67_v21 }
   0xe   :  { %v75_v34 = vadd.f32 %v74_v30, %v68_v25 }
  0x10   :  { %v76_v37 = vadd.f32 %v75_v34, %v69_v29 }
  0x12   :  { %v77_v39 = vadd.f32 %v76_v37, %v70_v33 }
  0x14   :  { %v78_v40 = vadd.f32 %v77_v39, %v71_v36 }
  0x16   :  { %v79_v41 = vadd.f32 %v78_v40, %v72_v38 }
  0x18   :  { %80 = vadd.xlane.f32.xlu0 %v79_v41 }
  0xa5   :  { %v81_v43 = vpop.xlane.xlu0 %80 }
  0xa6   :  { %v84_v44 = vadd.f32 %v83_v42, %v81_v43 }
  0xa8   :  { %86 = vst.msk [vmem:[%s147_s3] sm:$0xff] %vm85_vm0, %v84_v44 }

</bundles_post_ra>
